<compile_context>
chip_gen: v7x
topology: tpu7x:2x2x1
jax: 0.10.0
libtpu: 0.0.40
codegen_flags: <defaults>
</compile_context>

<pallas_src>
import functools
import math

import jax
import jax.numpy as jnp
from jax.experimental import pallas as pl
from jax.experimental.pallas import tpu as pltpu


CFG = dict(vocab=100, hidden=128, heads=4, inter=512, layers=2,
           max_pos=512, type_vocab=2, n_classes=4)
CLS_PAD = 128   # lane-dense padded classifier width


# ----------------------------------------------------------------------------
# Pallas kernels
# ----------------------------------------------------------------------------
def _ln_kernel(x_ref, g_ref, b_ref, o_ref, *, eps):
    """o = LayerNorm(x) * gamma + beta (embedding layernorm)."""
    h = x_ref[...]
    mu = jnp.mean(h, axis=-1, keepdims=True)
    var = jnp.mean((h - mu) ** 2, axis=-1, keepdims=True)
    n = (h - mu) * jax.lax.rsqrt(var + eps)
    o_ref[...] = (n * g_ref[...] + b_ref[...]).astype(o_ref.dtype)


def _encoder_layer_kernel(h_ref, m_ref,
                          wqkv_ref, bqkv_ref,
                          wo_ref, bo_ref, g1_ref, b1_ref,
                          w1_ref, bb1_ref, w2_ref, bb2_ref,
                          g2_ref, b2_ref,
                          o_ref, *, nheads, scale, eps):
    """One full BERT encoder layer for one batch element (all intermediates in VMEM)."""
    x = h_ref[0]                                       # (S, H) f32
    mask = m_ref[0]                                    # (1, S) additive mask, f32

    # --- fused q|k|v projection ---
    qkv = jnp.dot(x.astype(jnp.bfloat16), wqkv_ref[...],
                  preferred_element_type=jnp.float32) + bqkv_ref[...]   # (S, 3H) f32
    S, three_h = qkv.shape
    H = three_h // 3
    dh = H // nheads
    qkv_b = qkv.astype(jnp.bfloat16)

    # --- multi-head attention (static unroll over heads, lane slicing only) ---
    ctx = []
    for hh in range(nheads):
        qh = qkv_b[:, hh * dh:(hh + 1) * dh]
        kh = qkv_b[:, H + hh * dh:H + (hh + 1) * dh]
        vh = qkv_b[:, 2 * H + hh * dh:2 * H + (hh + 1) * dh]
        # contract last axes directly (no explicit k.T / XLU relayout)
        s = jax.lax.dot_general(qh, kh, (((1,), (1,)), ((), ())),
                                preferred_element_type=jnp.float32) * scale
        s = s + mask
        s = s - jnp.max(s, axis=-1, keepdims=True)
        p = jnp.exp(s)
        p = p * pl.reciprocal(jnp.sum(p, axis=-1, keepdims=True), approx=True)
        ctx.append(jnp.dot(p.astype(jnp.bfloat16), vh,
                           preferred_element_type=jnp.float32))
    ctx = jnp.concatenate(ctx, axis=1)                 # (S, H) f32, merge_heads layout

    # --- attention output projection + bias + residual + LayerNorm ---
    a = jnp.dot(ctx.astype(jnp.bfloat16), wo_ref[...],
                preferred_element_type=jnp.float32) + bo_ref[...] + x
    mu = jnp.mean(a, axis=-1, keepdims=True)
    var = jnp.mean((a - mu) ** 2, axis=-1, keepdims=True)
    h1 = (a - mu) * jax.lax.rsqrt(var + eps) * g1_ref[...] + b1_ref[...]

    # --- FFN: w1 + exact (erf) GELU + w2 + bias + residual + LayerNorm ---
    f = jnp.dot(h1.astype(jnp.bfloat16), w1_ref[...],
                preferred_element_type=jnp.float32) + bb1_ref[...]       # (S, I) f32
    f = 0.5 * f * (1.0 + jax.lax.erf(f * (1.0 / math.sqrt(2.0))))
    y = jnp.dot(f.astype(jnp.bfloat16), w2_ref[...],
                preferred_element_type=jnp.float32) + bb2_ref[...] + h1
    mu2 = jnp.mean(y, axis=-1, keepdims=True)
    var2 = jnp.mean((y - mu2) ** 2, axis=-1, keepdims=True)
    o_ref[0] = ((y - mu2) * jax.lax.rsqrt(var2 + eps)
                * g2_ref[...] + b2_ref[...]).astype(o_ref.dtype)


def _pool_cls_kernel(x_ref, wp_ref, bp_ref, wc_ref, bc_ref, o_ref):
    """logits = relu( tanh(x @ Wp + bp) @ Wc_pad + bc_pad ); Wc lane-padded to 128."""
    x = x_ref[...].astype(jnp.bfloat16)
    pooled = jnp.tanh(jnp.dot(x, wp_ref[...], preferred_element_type=jnp.float32)
                      + bp_ref[...])
    logits = jnp.dot(pooled.astype(jnp.bfloat16), wc_ref[...],
                     preferred_element_type=jnp.float32) + bc_ref[...]
    o_ref[...] = jnp.maximum(logits, 0.0).astype(o_ref.dtype)


# ----------------------------------------------------------------------------
# Pallas wrappers
# ----------------------------------------------------------------------------
def _row_tile(M):
    # 128-row tiles at these shapes; fall back to a single full block otherwise.
    return 128 if (M % 128 == 0) else M


def layernorm(x, gamma, beta, eps=1e-12):
    M, H = x.shape
    tm = _row_tile(M)
    return pl.pallas_call(
        functools.partial(_ln_kernel, eps=eps),
        out_shape=jax.ShapeDtypeStruct((M, H), jnp.float32),
        grid_spec=pltpu.PrefetchScalarGridSpec(
            num_scalar_prefetch=0,
            grid=(M // tm,),
            in_specs=[
                pl.BlockSpec((tm, H), lambda i: (i, 0)),
                pl.BlockSpec((1, H), lambda i: (0, 0)),
                pl.BlockSpec((1, H), lambda i: (0, 0)),
            ],
            out_specs=pl.BlockSpec((tm, H), lambda i: (i, 0)),
        ),
        compiler_params=pltpu.CompilerParams(dimension_semantics=("parallel",)),
    )(x, gamma.reshape(1, H), beta.reshape(1, H))


def encoder_layer(h, addmask, lyr, nheads, scale, eps=1e-12):
    """One fused BERT layer: h (B,S,H) f32 -> (B,S,H) f32, one pallas_call."""
    B, S, H = h.shape
    I = lyr["w1"].shape[1]
    return pl.pallas_call(
        functools.partial(_encoder_layer_kernel, nheads=nheads, scale=scale, eps=eps),
        out_shape=jax.ShapeDtypeStruct((B, S, H), jnp.float32),
        grid_spec=pltpu.PrefetchScalarGridSpec(
            num_scalar_prefetch=0,
            grid=(B,),
            in_specs=[
                pl.BlockSpec((1, S, H), lambda i: (i, 0, 0)),   # hidden state
                pl.BlockSpec((1, 1, S), lambda i: (i, 0, 0)),   # additive mask
                pl.BlockSpec((H, 3 * H), lambda i: (0, 0)),     # wqkv
                pl.BlockSpec((1, 3 * H), lambda i: (0, 0)),     # bqkv
                pl.BlockSpec((H, H), lambda i: (0, 0)),         # wo
                pl.BlockSpec((1, H), lambda i: (0, 0)),         # bo
                pl.BlockSpec((1, H), lambda i: (0, 0)),         # ln1 gamma
                pl.BlockSpec((1, H), lambda i: (0, 0)),         # ln1 beta
                pl.BlockSpec((H, I), lambda i: (0, 0)),         # w1
                pl.BlockSpec((1, I), lambda i: (0, 0)),         # b1
                pl.BlockSpec((I, H), lambda i: (0, 0)),         # w2
                pl.BlockSpec((1, H), lambda i: (0, 0)),         # b2
                pl.BlockSpec((1, H), lambda i: (0, 0)),         # ln2 gamma
                pl.BlockSpec((1, H), lambda i: (0, 0)),         # ln2 beta
            ],
            out_specs=pl.BlockSpec((1, S, H), lambda i: (i, 0, 0)),
        ),
        compiler_params=pltpu.CompilerParams(dimension_semantics=("parallel",)),
    )(h, addmask,
      lyr["wqkv"], lyr["bqkv"].reshape(1, -1),
      lyr["wo"], lyr["bo"].reshape(1, -1),
      lyr["ln1_g"].reshape(1, -1), lyr["ln1_b"].reshape(1, -1),
      lyr["w1"], lyr["b1"].reshape(1, -1),
      lyr["w2"], lyr["b2"].reshape(1, -1),
      lyr["ln2_g"].reshape(1, -1), lyr["ln2_b"].reshape(1, -1))


def pooler_classifier(cls_tok, wp, bp, wc_pad, bc_pad, n_classes):
    B, H = cls_tok.shape
    Np = wc_pad.shape[1]
    out = pl.pallas_call(
        _pool_cls_kernel,
        out_shape=jax.ShapeDtypeStruct((B, Np), jnp.float32),
        grid_spec=pltpu.PrefetchScalarGridSpec(
            num_scalar_prefetch=0,
            grid=(1,),
            in_specs=[
                pl.BlockSpec((B, H), lambda i: (0, 0)),
                pl.BlockSpec((H, H), lambda i: (0, 0)),
                pl.BlockSpec((1, H), lambda i: (0, 0)),
                pl.BlockSpec((H, Np), lambda i: (0, 0)),
                pl.BlockSpec((1, Np), lambda i: (0, 0)),
            ],
            out_specs=pl.BlockSpec((B, Np), lambda i: (0, 0)),
        ),
    )(cls_tok, wp, bp.reshape(1, H), wc_pad, bc_pad.reshape(1, Np))
    return out[:, :n_classes]


# ----------------------------------------------------------------------------
# Model: parameter init + forward pass
# ----------------------------------------------------------------------------
def init_params(key, cfg=CFG):
    H, I = cfg["hidden"], cfg["inter"]
    keys = iter(jax.random.split(key, 64))

    def dense(k, din, dout):
        # weights stored bf16 (MXU-native input dtype); biases / LN params stay f32
        return (0.02 * jax.random.normal(k, (din, dout), jnp.float32)).astype(jnp.bfloat16)

    nc = cfg["n_classes"]
    cls_w = dense(next(keys), H, nc)
    cls_w_pad = jnp.zeros((H, CLS_PAD), jnp.bfloat16).at[:, :nc].set(cls_w)
    cls_b_pad = jnp.zeros((CLS_PAD,), jnp.float32)

    params = {
        "word_emb": 0.02 * jax.random.normal(next(keys), (cfg["vocab"], H), jnp.float32),
        "pos_emb": 0.02 * jax.random.normal(next(keys), (cfg["max_pos"], H), jnp.float32),
        "type_emb": 0.02 * jax.random.normal(next(keys), (cfg["type_vocab"], H), jnp.float32),
        "emb_ln_g": jnp.ones((H,), jnp.float32),
        "emb_ln_b": jnp.zeros((H,), jnp.float32),
        "pool_w": dense(next(keys), H, H),
        "pool_b": jnp.zeros((H,), jnp.float32),
        "cls_w_pad": cls_w_pad,
        "cls_b_pad": cls_b_pad,
        "layers": [],
    }
    for _ in range(cfg["layers"]):
        layer = {
            # fused q|k|v projection
            "wqkv": dense(next(keys), H, 3 * H), "bqkv": jnp.zeros((3 * H,), jnp.float32),
            "wo": dense(next(keys), H, H), "bo": jnp.zeros((H,), jnp.float32),
            "ln1_g": jnp.ones((H,), jnp.float32), "ln1_b": jnp.zeros((H,), jnp.float32),
            "w1": dense(next(keys), H, I), "b1": jnp.zeros((I,), jnp.float32),
            "w2": dense(next(keys), I, H), "b2": jnp.zeros((H,), jnp.float32),
            "ln2_g": jnp.ones((H,), jnp.float32), "ln2_b": jnp.zeros((H,), jnp.float32),
        }
        params["layers"].append(layer)
    return params


def bert_classifier_forward(params, input_ids, mask, cfg=CFG):
    H, nH = cfg["hidden"], cfg["heads"]
    dh = H // nH
    B, S = input_ids.shape

    # --- embeddings (gather is JAX glue, layernorm is a Pallas kernel) ---
    we = jnp.take(params["word_emb"], input_ids, axis=0)                  # (B,S,H)
    pe = params["pos_emb"][:S][None, :, :]                                # (1,S,H)
    te = jnp.take(params["type_emb"], jnp.zeros_like(input_ids), axis=0)  # (B,S,H)
    h = (we + pe + te).reshape(B * S, H)                                  # f32
    h = layernorm(h, params["emb_ln_g"], params["emb_ln_b"]).reshape(B, S, H)

    # --- additive attention mask kept at (B, 1, S): no per-head replication ---
    addmask = ((1.0 - mask.astype(jnp.float32)) * -1e9).reshape(B, 1, S)
    scale = 1.0 / math.sqrt(dh)

    # --- transformer encoder: ONE fused pallas_call per layer ---
    for lyr in params["layers"]:
        h = encoder_layer(h, addmask, lyr, nH, scale)

    # --- pooler + classifier head fused: tanh(W_p h[:,0] + b_p) -> linear -> relu ---
    # TODO(synk): nn.Dropout(0.5) is identity in eval mode; training-mode stochastic
    # dropout (pltpu.prng_random_bits masking) is intentionally not applied here.
    cls_tok = h[:, 0, :]                                                  # (B,H)
    logits = pooler_classifier(cls_tok, params["pool_w"], params["pool_b"],
                               params["cls_w_pad"], params["cls_b_pad"],
                               cfg["n_classes"])
    return logits                                                          # (B, n_classes)


# ----------------------------------------------------------------------------
if __name__ == "__main__":
    key = jax.random.PRNGKey(0)
    pkey, ikey = jax.random.split(key)

    B, S = 2, 128
    params = init_params(pkey)
    input_ids = jax.random.randint(ikey, (B, S), 0, CFG["vocab"], dtype=jnp.int32)
    mask = jnp.ones((B, S), jnp.float32)
    mask = mask.at[1, S - 16:].set(0.0)  # pad out the tail of the second sequence

    out = bert_classifier_forward(params, input_ids, mask)
    out = jax.block_until_ready(out)
    assert out.shape == (B, CFG["n_classes"]) and out.dtype == jnp.float32
    assert bool(jnp.all(out >= 0.0))  # ReLU output is non-negative
    print("KERNEL_OK")
</pallas_src>

<mosaic_0001>
module attributes {stable_mosaic.version = 11 : i64} {
  func.func @_ln_kernel(%arg0: i32, %arg1: memref<128x128xf32, #tpu.memory_space<vmem>>, %arg2: memref<1x128xf32, #tpu.memory_space<vmem>>, %arg3: memref<1x128xf32, #tpu.memory_space<vmem>>, %arg4: memref<128x128xf32, #tpu.memory_space<vmem>>) attributes {dimension_semantics = [#tpu.dimension_semantics<parallel>], iteration_bounds = array<i64: 2>, scalar_prefetch = 0 : i64, scratch_operands = 0 : i64, tpu.core_type = #tpu.core_type<tc>, window_params = [{transform_indices = @transform_0, window_bounds = array<i64: 128, 128>}, {pipeline_mode = #tpu.pipeline_mode<synchronous>, transform_indices = @transform_1, window_bounds = array<i64: 1, 128>}, {pipeline_mode = #tpu.pipeline_mode<synchronous>, transform_indices = @transform_2, window_bounds = array<i64: 1, 128>}, {transform_indices = @transform_3, window_bounds = array<i64: 128, 128>}]} {
    %c0 = arith.constant 0 : index
    %c0_0 = arith.constant 0 : index
    %0 = vector.load %arg1[%c0, %c0_0] : memref<128x128xf32, #tpu.memory_space<vmem>>, vector<128x128xf32>
    %cst = arith.constant dense<0.000000e+00> : vector<128xf32>
    %1 = vector.multi_reduction <add>, %0, %cst [1] : vector<128x128xf32> to vector<128xf32>
    %2 = vector.shape_cast %1 : vector<128xf32> to vector<128x1xf32>
    %cst_1 = arith.constant 1.280000e+02 : f32
    %3 = vector.broadcast %cst_1 : f32 to vector<128x1xf32>
    %4 = arith.divf %2, %3 : vector<128x1xf32>
    %5 = vector.broadcast %4 : vector<128x1xf32> to vector<128x128xf32>
    %6 = arith.subf %0, %5 : vector<128x128xf32>
    %7 = arith.mulf %6, %6 : vector<128x128xf32>
    %cst_2 = arith.constant dense<0.000000e+00> : vector<128xf32>
    %8 = vector.multi_reduction <add>, %7, %cst_2 [1] : vector<128x128xf32> to vector<128xf32>
    %9 = vector.shape_cast %8 : vector<128xf32> to vector<128x1xf32>
    %cst_3 = arith.constant 1.280000e+02 : f32
    %10 = vector.broadcast %cst_3 : f32 to vector<128x1xf32>
    %11 = arith.divf %9, %10 : vector<128x1xf32>
    %12 = vector.broadcast %4 : vector<128x1xf32> to vector<128x128xf32>
    %13 = arith.subf %0, %12 : vector<128x128xf32>
    %cst_4 = arith.constant 9.99999996E-13 : f32
    %14 = vector.broadcast %cst_4 : f32 to vector<128x1xf32>
    %15 = arith.addf %11, %14 : vector<128x1xf32>
    %16 = math.rsqrt %15 : vector<128x1xf32>
    %17 = vector.broadcast %16 : vector<128x1xf32> to vector<128x128xf32>
    %18 = arith.mulf %13, %17 : vector<128x128xf32>
    %c0_5 = arith.constant 0 : index
    %c0_6 = arith.constant 0 : index
    %19 = vector.load %arg2[%c0_5, %c0_6] : memref<1x128xf32, #tpu.memory_space<vmem>>, vector<1x128xf32>
    %20 = vector.broadcast %19 : vector<1x128xf32> to vector<128x128xf32>
    %21 = arith.mulf %18, %20 : vector<128x128xf32>
    %c0_7 = arith.constant 0 : index
    %c0_8 = arith.constant 0 : index
    %22 = vector.load %arg3[%c0_7, %c0_8] : memref<1x128xf32, #tpu.memory_space<vmem>>, vector<1x128xf32>
    %23 = vector.broadcast %22 : vector<1x128xf32> to vector<128x128xf32>
    %24 = arith.addf %21, %23 : vector<128x128xf32>
    %c0_9 = arith.constant 0 : index
    %c0_10 = arith.constant 0 : index
    %25 = vector.load %arg4[%c0_9, %c0_10] : memref<128x128xf32, #tpu.memory_space<vmem>>, vector<128x128xf32>
    tpu.vector_store %arg4[%c0_9, %c0_10], %24 {strides = array<i32>} : memref<128x128xf32, #tpu.memory_space<vmem>>, vector<128x128xf32>,
    return
  }
  func.func @transform_0(%arg0: i32) -> (i32, i32) {
    %c0_i32 = arith.constant 0 : i32
    %c0_i32_0 = arith.constant 0 : i32
    return %arg0, %c0_i32 : i32, i32
  }
  func.func @transform_1(%arg0: i32) -> (i32, i32) {
    %c0_i32 = arith.constant 0 : i32
    %c0_i32_0 = arith.constant 0 : i32
    %c0_i32_1 = arith.constant 0 : i32
    return %c0_i32, %c0_i32_0 : i32, i32
  }
  func.func @transform_2(%arg0: i32) -> (i32, i32) {
    %c0_i32 = arith.constant 0 : i32
    %c0_i32_0 = arith.constant 0 : i32
    %c0_i32_1 = arith.constant 0 : i32
    return %c0_i32, %c0_i32_0 : i32, i32
  }
  func.func @transform_3(%arg0: i32) -> (i32, i32) {
    %c0_i32 = arith.constant 0 : i32
    %c0_i32_0 = arith.constant 0 : i32
    return %arg0, %c0_i32 : i32, i32
  }
}

</mosaic_0001>

<bundles_post_ra>
// kernel: tpu_custom_call.1
= control target key start
LH: loop header
LB: loop body
LE: loop exit
PB: predicated region body
PF: predicated region fallthrough
CT: control target
= control target key end

     0   :  { %8 = vsyncpa [#allocation3], 0  ;;  %s1102_s0 = inlined_call_operand.hbm [shape: f32[256,128], index: 0, kind: input, shape index: {}]   ;;  %s1103_s1 = inlined_call_operand.vmem [shape: f32[1,128], index: 1, kind: input, shape index: {}]   ;;  %s1104_s2 = inlined_call_operand.vmem [shape: f32[1,128], index: 2, kind: input, shape index: {}]   ;;  %s1105_s3 = inlined_call_operand.hbm [shape: f32[256,128], index: 3, kind: output, shape index: {}]  }
   0x1   :  { %10 = vsyncpa [#allocation3 + $0x1], 0 }
   0x2   :  { %11 = vsyncpa [#allocation4], 0 }
   0x3   :  { %13 = vsyncpa [#allocation4 + $0x1], 0  ;;  %s757_s12 = smov 0   ;;  %s759_s13 = smov 0  }
   0x4   :  { %s761_s14 = smov 0   ;;  %s763_s15 = smov 0  }
   0x5 LB: > { %s778_s16 = sadd.s32 4294967295, %s729_s15   ;;  %s533_s17 = sadd.s32 4294967294, %s729_s15   ;;  %s729_s15 = sphi %s763_s15, %s1118_s15   ;;  %s725_s14 = sphi %s761_s14, %s1117_s14   ;;  %s721_s13 = sphi %s759_s13, %s1116_s13   ;;  %s717_s12 = sphi %s757_s12, %s1115_s12  }
   0x6   : > { %s782_s18 = sadd.s32 1, %s729_s15   ;;  %s26_s19 = sadd.s32 1, %s725_s14 }
   0x7   : > { %s23_s20 = ssub.s32 %s729_s15, %s782_s18  ;;  %p33_p0 = scmp.ne.s32.totalorder %s725_s14, %s721_s13 }
   0x8   : > { %p24_p1 = scmp.eq.s32.totalorder %s23_s20, 0  ;;  %p34_p2 = scmp.eq.s32.totalorder %s729_s15, 0 }
   0x9   : > { %p39_p3 = scmp.ne.s32.totalorder %s721_s13, %s717_s12  ;;  %p40_p4 = scmp.eq.s32.totalorder %s778_s16, 0 }
   0xa   : > { %s794_s21 = scalar_select %p24_p1, %s725_s14, %s26_s19  }
   0xb   : > { %p796_p5 = por %p34_p2, %p33_p0  ;;  %p800_p6 = por %p40_p4, %p39_p3 }
   0xc   : > { %p105_p7 = scmp.eq.s32.totalorder %s778_s16, 1  ;;  %p111_p8 = scmp.eq.s32.totalorder %s533_s17, 1 }
   0xd   : > { %p563_p10 = scmp.lt.s32.totalorder %s729_s15, 2  ;;  %s137_s26 = sand.u32 1, %s725_s14  }
   0xe   : > { %p807_p11 = por %p105_p7, %p33_p0  ;;  %p811_p12 = por %p111_p8, %p39_p3 }
   0xf   : > { %s549_s27 = sshll.u32 %s729_s15, 11  ;;  %s536_s28 = sshll.u32 %s137_s26, 7 }
  0x10   : > { %s1109_s24 = scalar_select %p807_p11, 1, 0 }
  0x11   : > { %s1110_s25 = scalar_select %p811_p12, 1, 0 }
  0x12   : > { %s820_s4 = scalar_lea.hbm %s1102_s0, %s549_s27  ;;  %s141_s5 = scalar_lea.vmem [#allocation2], %s536_s28 }
  0x13   : > { %s148_s6 = sshll.u32 %s141_s5, 4  ;;  %p824_p13 = pnand %p563_p10, %p796_p5  ;;  %s828_s6 = int_to_ptr.vmem [resolvable:$true] %s148_s6 }
  0x14   : > { %s830_s8 = scalar_lea.sflag [#allocation3], %s137_s26  ;;  %s633_s9 = scalar_lea.hbm %s820_s4, 2048 }
  0x15   : > { %p634_p0 = scmp.ne.s32.totalorder %s820_s4, %s633_s9  ;;  %p635_p1 = pneg %p824_p13 }
  0x16   : > { %s638_s17 = scalar_lea.hbm %s1102_s0, 4096  ;;  %p639_p4 = scmp.lt.u32.totalorder %s820_s4, %s1102_s0 }
  0x17   : > { %p636_p2 = pnand %p635_p1, %p634_p0  ;;  %p640_p5 = scmp.lt.u32.totalorder %s638_s17, %s633_s9 }
  0x18   : > { %p642_p8 = scmp.lt.u32.totalorder %s633_s9, %s820_s4 }
  0x19   : > { %p637_p3 = pneg %p636_p2  ;;  %p641_p7 = por %p640_p5, %p639_p4 }
  0x1b   : > { %p643_p10 = por %p642_p8, %p641_p7 }
  0x1d   : > { %p644_p9 = pnand %p643_p10, %p637_p3 }
  0x1f   : > { %647 = shalt.err (!%p644_p9)
}
  0x20   : > { %s648_s22 = scalar_lea.vmem %s828_s6, 2048  ;;  %s731_s26 = smov [#allocation2]  }
  0x21   : > { %p649_p0 = scmp.ne.s32.totalorder %s828_s6, %s648_s22  ;;  %s653_s27 = sshll.u32 %s731_s26, 4  ;;  %s654_s27 = int_to_ptr.vmem [resolvable:$false] %s653_s27 }
  0x22   : > { %s655_s28 = scalar_lea.vmem %s654_s27, 4096  ;;  %p656_p11 = scmp.lt.s32.totalorder %s828_s6, %s654_s27 }
  0x23   : > { %p651_p2 = pnand %p649_p0, %p635_p1  ;;  %p657_p4 = scmp.lt.s32.totalorder %s655_s28, %s648_s22 }
  0x25   : > { %p652_p12 = pneg %p651_p2  ;;  %p658_p5 = por %p657_p4, %p656_p11 }
  0x27   : > { %p659_p7 = pnand %p658_p5, %p652_p12 }
  0x29   : > { %662 = shalt.err (!%p659_p7)
}
  0x2a   : > { %s732_s29 = smov 128   ;;  %s733_s30 = smov 8  }
  0x2b   : > { %558 = dma.hbm_to_vmem [thread:$0]  (!%p824_p13), %s820_s4, 2048, %s828_s6, %s830_s8, %s732_s29, %s732_s29, %s733_s30  }
  0x2c   : > { %p539_p9 = scmp.ge.s32.totalorder %s729_s15, 1  ;;  %p156_p1 = scmp.lt.s32.totalorder %s729_s15, 3 }
  0x2e   : > { %p157_p3 = pnand %p539_p9, %p156_p1 }
  0x2f   : > { %s861_s5 = sand.u32 (!%p157_p3), 1, %s721_s13  }
  0x30   : > { %160 = sbr.rel (%p157_p3) target bundleno = 415 (0x19f), region = 32  ;;  %s540_s9 = sshll.u32 (!%p157_p3), %s861_s5, 7 }
  0x31   : > { %s163_s10 = scalar_lea.sflag (!%p157_p3), [#allocation3], %s861_s5  ;;  %s867_s11 = scalar_lea.vmem (!%p157_p3), [#allocation2], %s540_s9 }
  0x37   : > { %708 = dma.done.wait (%p800_p6), %s163_s10, 2048  }
  0x38   : > { %710 = vsyncadd (%p800_p6), %s163_s10, 4294965248  ;;  %v191_v0 = vld [vmem:[%s867_s11] sm:$0xff]  ;;  %v193_v1 = vld [vmem:[%s867_s11 + $0x10] sm:$0xff]  ;;  %s990_s8 = scalar_lea.vmem [#allocation5], %s540_s9  ;;  %s550_s17 = sshll.u32 %s778_s16, 11 }
  0x39   : > { %207 = vadd.xlane.f32.xlu0 %v191_v0  ;;  %211 = vadd.xlane.f32.xlu1 %v193_v1  ;;  %v192_v2 = vld [vmem:[%s867_s11 + $0x8] sm:$0xff]  ;;  %v194_v3 = vld [vmem:[%s867_s11 + $0x18] sm:$0xff]  ;;  %v195_v4 = vld [vmem:[%s867_s11 + $0x20] sm:$0xff]  ;;  %s460_s19 = sshll.u32 %s990_s8, 4  ;;  %s1054_s26 = scalar_lea.hbm %s1105_s3, %s550_s17  ;;  %s1056_s19 = int_to_ptr.vmem [resolvable:$true] %s460_s19 }
  0x3a   : > { %v196_v5 = vld [vmem:[%s867_s11 + $0x28] sm:$0xff]  ;;  %v197_v6 = vld [vmem:[%s867_s11 + $0x30] sm:$0xff]  ;;  %v198_v7 = vld [vmem:[%s867_s11 + $0x38] sm:$0xff]  ;;  %s447_s16 = scalar_lea.sflag [#allocation4], %s861_s5  ;;  %s663_s27 = scalar_lea.vmem %s1056_s19, 2048 }
  0x3b   : > { %v199_v8 = vld [vmem:[%s867_s11 + $0x40] sm:$0xff]  ;;  %v200_v9 = vld [vmem:[%s867_s11 + $0x48] sm:$0xff]  ;;  %v201_v10 = vld [vmem:[%s867_s11 + $0x50] sm:$0xff]  ;;  %p664_p6 = scmp.ne.s32.totalorder %s1056_s19, %s663_s27  ;;  %p1112_p11 = scmp.ne.s32.totalorder %s1109_s24, 0 }
  0x3c   : > { %v885_v11 = vld [vmem:[%s867_s11 + $0x58] sm:$0xff]  ;;  %v889_v12 = vld [vmem:[%s867_s11 + $0x60] sm:$0xff]  ;;  %v892_v13 = vld [vmem:[%s867_s11 + $0x68] sm:$0xff]  ;;  %s734_s28 = smov [#allocation5]  }
  0x3d   : > { %209 = vadd.xlane.f32.xlu0 %v192_v2  ;;  %213 = vadd.xlane.f32.xlu1 %v194_v3  ;;  %v897_v14 = vld [vmem:[%s867_s11 + $0x70] sm:$0xff]  ;;  %v900_v15 = vld [vmem:[%s867_s11 + $0x78] sm:$0xff]  ;;  %p665_p12 = pnand %p664_p6, %p1112_p11  ;;  %s667_s29 = sshll.u32 %s734_s28, 4  ;;  %s668_s29 = int_to_ptr.vmem [resolvable:$false] %s667_s29 }
  0x3e   : > { %s669_s30 = scalar_lea.vmem %s668_s29, 4096  ;;  %p670_p8 = scmp.lt.s32.totalorder %s1056_s19, %s668_s29 }
  0x3f   : > { %p666_p13 = pneg %p665_p12  ;;  %p671_p10 = scmp.lt.s32.totalorder %s669_s30, %s663_s27 }
  0x41   : > { %215 = vadd.xlane.f32.xlu0 %v195_v4  ;;  %217 = vadd.xlane.f32.xlu1 %v196_v5  ;;  %p672_p0 = por %p671_p10, %p670_p8 }
  0x43   : > { %p673_p2 = pnand %p672_p0, %p666_p13 }
  0x45   : > { %219 = vadd.xlane.f32.xlu0 %v197_v6  ;;  %221 = vadd.xlane.f32.xlu1 %v198_v7 }
  0x49   : > { %223 = vadd.xlane.f32.xlu0 %v199_v8  ;;  %225 = vadd.xlane.f32.xlu1 %v200_v9 }
  0x4d   : > { %227 = vadd.xlane.f32.xlu0 %v201_v10  ;;  %229 = vadd.xlane.f32.xlu1 %v885_v11 }
  0x51   : > { %231 = vadd.xlane.f32.xlu0 %v889_v12  ;;  %233 = vadd.xlane.f32.xlu1 %v892_v13 }
  0x55   : > { %235 = vadd.xlane.f32.xlu0 %v897_v14  ;;  %237 = vadd.xlane.f32.xlu1 %v900_v15 }
  0xc6   : > { %v208_v16 = vpop.xlane.xlu0 %207  ;;  %v212_v17 = vpop.xlane.xlu1 %211 }
  0xc7   : > { %v240_v18 = vmul.f32 0.0078125, %v208_v16  ;;  %v242_v19 = vmul.f32 0.0078125, %v212_v17 }
  0xc9   : > { %v904_v20 = vsub.f32 %v191_v0, %v240_v18  ;;  %v906_v21 = vsub.f32 %v193_v1, %v242_v19 }
  0xca   : > { %v210_v22 = vpop.xlane.xlu0 %209  ;;  %v214_v23 = vpop.xlane.xlu1 %213 }
  0xcb   : > { %v241_v24 = vmul.f32 0.0078125, %v210_v22  ;;  %v272_v25 = vmul.f32 %v904_v20, %v904_v20  ;;  %v243_v26 = vmul.f32 0.0078125, %v214_v23  ;;  %v274_v29 = vmul.f32 %v906_v21, %v906_v21 }
  0xcd   : > { %v910_v27 = vsub.f32 %v192_v2, %v241_v24  ;;  %288 = vadd.xlane.f32.xlu0 %v272_v25  ;;  %v912_v28 = vsub.f32 %v194_v3, %v243_v26 }
  0xce   : > { %v216_v30 = vpop.xlane.xlu0 %215  ;;  %v218_v31 = vpop.xlane.xlu1 %217 }
  0xcf   : > { %v244_v32 = vmul.f32 0.0078125, %v216_v30  ;;  %v273_v33 = vmul.f32 %v910_v27, %v910_v27  ;;  %v245_v34 = vmul.f32 0.0078125, %v218_v31  ;;  %v275_v37 = vmul.f32 %v912_v28, %v912_v28 }
  0xd1   : > { %v918_v35 = vsub.f32 %v195_v4, %v244_v32  ;;  %292 = vadd.xlane.f32.xlu0 %v274_v29  ;;  %290 = vadd.xlane.f32.xlu1 %v273_v33  ;;  %v920_v36 = vsub.f32 %v196_v5, %v245_v34 }
  0xd2   : > { %v220_v38 = vpop.xlane.xlu0 %219  ;;  %v222_v39 = vpop.xlane.xlu1 %221 }
  0xd3   : > { %v246_v40 = vmul.f32 0.0078125, %v220_v38  ;;  %v276_v41 = vmul.f32 %v918_v35, %v918_v35  ;;  %v247_v42 = vmul.f32 0.0078125, %v222_v39  ;;  %v277_v45 = vmul.f32 %v920_v36, %v920_v36 }
  0xd5   : > { %v926_v43 = vsub.f32 %v197_v6, %v246_v40  ;;  %294 = vadd.xlane.f32.xlu1 %v275_v37  ;;  %296 = vadd.xlane.f32.xlu0 %v276_v41  ;;  %v928_v44 = vsub.f32 %v198_v7, %v247_v42  ;;  %v976_v42 = vld [vmem:[%s1103_s1] ss:$0 sm:$0xff] }
  0xd6   : > { %v224_v46 = vpop.xlane.xlu0 %223  ;;  %v226_v47 = vpop.xlane.xlu1 %225 }
  0xd7   : > { %v248_v48 = vmul.f32 0.0078125, %v224_v46  ;;  %v278_v49 = vmul.f32 %v926_v43, %v926_v43  ;;  %v249_v50 = vmul.f32 0.0078125, %v226_v47  ;;  %v279_v53 = vmul.f32 %v928_v44, %v928_v44 }
  0xd9   : > { %v934_v51 = vsub.f32 %v199_v8, %v248_v48  ;;  %298 = vadd.xlane.f32.xlu1 %v277_v45  ;;  %300 = vadd.xlane.f32.xlu0 %v278_v49  ;;  %v936_v52 = vsub.f32 %v200_v9, %v249_v50  ;;  %v982_v50 = vld [vmem:[%s1104_s2] ss:$0 sm:$0xff] }
  0xda   : > { %v228_v54 = vpop.xlane.xlu0 %227  ;;  %v230_v55 = vpop.xlane.xlu1 %229 }
  0xdb   : > { %v250_v56 = vmul.f32 0.0078125, %v228_v54  ;;  %v280_v57 = vmul.f32 %v934_v51, %v934_v51  ;;  %v251_v58 = vmul.f32 0.0078125, %v230_v55  ;;  %v281_v61 = vmul.f32 %v936_v52, %v936_v52 }
  0xdd   : > { %v942_v59 = vsub.f32 %v201_v10, %v250_v56  ;;  %302 = vadd.xlane.f32.xlu1 %v279_v53  ;;  %304 = vadd.xlane.f32.xlu0 %v280_v57  ;;  %v945_v60 = vsub.f32 %v885_v11, %v251_v58 }
  0xde   : > { %v232_v62 = vpop.xlane.xlu0 %231  ;;  %v234_v63 = vpop.xlane.xlu1 %233 }
  0xdf   : > { %v252_v0 = vmul.f32 0.0078125, %v232_v62  ;;  %v282_v1 = vmul.f32 %v942_v59, %v942_v59  ;;  %v253_v2 = vmul.f32 0.0078125, %v234_v63  ;;  %v283_v5 = vmul.f32 %v945_v60, %v945_v60 }
  0xe1   : > { %v952_v3 = vsub.f32 %v889_v12, %v252_v0  ;;  %306 = vadd.xlane.f32.xlu1 %v281_v61  ;;  %308 = vadd.xlane.f32.xlu0 %v282_v1  ;;  %v955_v4 = vsub.f32 %v892_v13, %v253_v2 }
  0xe2   : > { %v236_v6 = vpop.xlane.xlu0 %235  ;;  %v238_v7 = vpop.xlane.xlu1 %237 }
  0xe3   : > { %v254_v8 = vmul.f32 0.0078125, %v236_v6  ;;  %v284_v9 = vmul.f32 %v952_v3, %v952_v3  ;;  %v255_v10 = vmul.f32 0.0078125, %v238_v7  ;;  %v285_v13 = vmul.f32 %v955_v4, %v955_v4 }
  0xe5   : > { %v962_v11 = vsub.f32 %v897_v14, %v254_v8  ;;  %310 = vadd.xlane.f32.xlu1 %v283_v5  ;;  %312 = vadd.xlane.f32.xlu0 %v284_v9  ;;  %v965_v12 = vsub.f32 %v900_v15, %v255_v10 }
  0xe7   : > { %v286_v16 = vmul.f32 %v962_v11, %v962_v11  ;;  %v287_v17 = vmul.f32 %v965_v12, %v965_v12 }
  0xe9   : > { %314 = vadd.xlane.f32.xlu1 %v285_v13  ;;  %316 = vadd.xlane.f32.xlu0 %v286_v16 }
  0xed   : > { %318 = vadd.xlane.f32.xlu1 %v287_v17 }
 0x15a   : > { %v289_v18 = vpop.xlane.xlu0 %288 }
 0x15b   : > { %v320_v14 = vmul.f32 0.0078125, %v289_v18 }
 0x15d   : > { %v336_v19 = vadd.f32 1e-12, %v320_v14 }
 0x15e   : > { %v291_v22 = vpop.xlane.xlu1 %290  ;;  %v293_v23 = vpop.xlane.xlu0 %292 }
 0x15f   : > { %601 = vrsqrt.f32 %v336_v19  ;;  %v321_v15 = vmul.f32 0.0078125, %v291_v22  ;;  %v322_v24 = vmul.f32 0.0078125, %v293_v23 }
 0x161   : > { %v337_v25 = vadd.f32 1e-12, %v321_v15  ;;  %v338_v26 = vadd.f32 1e-12, %v322_v24 }
 0x162   : > { %v295_v29 = vpop.xlane.xlu1 %294  ;;  %v297_v30 = vpop.xlane.xlu0 %296 }
 0x163   : > { %603 = vrsqrt.f32 %v337_v25  ;;  %v323_v31 = vmul.f32 0.0078125, %v295_v29  ;;  %v324_v32 = vmul.f32 0.0078125, %v297_v30 }
 0x164   : > { %605 = vrsqrt.f32 %v338_v26 }
 0x165   : > { %v339_v33 = vadd.f32 1e-12, %v323_v31  ;;  %v340_v34 = vadd.f32 1e-12, %v324_v32 }
 0x166   : > { %v299_v37 = vpop.xlane.xlu1 %298  ;;  %v301_v38 = vpop.xlane.xlu0 %300 }
 0x167   : > { %607 = vrsqrt.f32 %v339_v33  ;;  %v325_v39 = vmul.f32 0.0078125, %v299_v37  ;;  %v326_v40 = vmul.f32 0.0078125, %v301_v38 }
 0x168   : > { %609 = vrsqrt.f32 %v340_v34 }
 0x169   : > { %v602_v41 = vpop.eup %601  ;;  %v341_v45 = vadd.f32 1e-12, %v325_v39  ;;  %v342_v46 = vadd.f32 1e-12, %v326_v40 }
 0x16a   : > { %v368_v47 = vmul.f32 %v602_v41, %v904_v20  ;;  %v303_v48 = vpop.xlane.xlu1 %302  ;;  %v305_v49 = vpop.xlane.xlu0 %304 }
 0x16b   : > { %611 = vrsqrt.f32 %v341_v45  ;;  %v327_v53 = vmul.f32 0.0078125, %v303_v48  ;;  %v328_v54 = vmul.f32 0.0078125, %v305_v49 }
 0x16c   : > { %v391_v55 = vmul.f32 %v976_v42, %v368_v47  ;;  %613 = vrsqrt.f32 %v342_v46 }
 0x16d   : > { %v604_v56 = vpop.eup %603  ;;  %v343_v57 = vadd.f32 1e-12, %v327_v53  ;;  %v344_v58 = vadd.f32 1e-12, %v328_v54 }
 0x16e   : > { %v606_v61 = vpop.eup %605  ;;  %v414_v20 = vadd.f32 %v982_v50, %v391_v55  ;;  %v369_v62 = vmul.f32 %v604_v56, %v910_v27  ;;  %v307_v63 = vpop.xlane.xlu1 %306 }
 0x16f   : > { %v309_v0 = vpop.xlane.xlu0 %308  ;;  %v370_v1 = vmul.f32 %v606_v61, %v906_v21  ;;  %615 = vrsqrt.f32 %v343_v57  ;;  %v329_v2 = vmul.f32 0.0078125, %v307_v63 }
 0x170   : > { %v330_v5 = vmul.f32 0.0078125, %v309_v0  ;;  %430 = vst [vmem:[%s990_s8] sm:$0xff] %v414_v20  ;;  %v392_v6 = vmul.f32 %v976_v42, %v369_v62  ;;  %617 = vrsqrt.f32 %v344_v58 }
 0x171   : > { %v608_v7 = vpop.eup %607  ;;  %v393_v8 = vmul.f32 %v976_v42, %v370_v1  ;;  %v345_v27 = vadd.f32 1e-12, %v329_v2 }
 0x172   : > { %v346_v9 = vadd.f32 1e-12, %v330_v5  ;;  %v610_v10 = vpop.eup %609  ;;  %v415_v21 = vadd.f32 %v982_v50, %v392_v6  ;;  %v371_v13 = vmul.f32 %v608_v7, %v912_v28  ;;  %v311_v16 = vpop.xlane.xlu1 %310 }
 0x173   : > { %v313_v17 = vpop.xlane.xlu0 %312  ;;  %v416_v18 = vadd.f32 %v982_v50, %v393_v8  ;;  %v372_v14 = vmul.f32 %v610_v10, %v918_v35  ;;  %619 = vrsqrt.f32 %v345_v27  ;;  %v331_v19 = vmul.f32 0.0078125, %v311_v16 }
 0x174   : > { %431 = vst [vmem:[%s990_s8 + $0x8] sm:$0xff] %v415_v21  ;;  %v394_v22 = vmul.f32 %v976_v42, %v371_v13  ;;  %621 = vrsqrt.f32 %v346_v9  ;;  %v332_v23 = vmul.f32 0.0078125, %v313_v17 }
 0x175   : > { %v612_v15 = vpop.eup %611  ;;  %432 = vst [vmem:[%s990_s8 + $0x10] sm:$0xff] %v416_v18  ;;  %v395_v24 = vmul.f32 %v976_v42, %v372_v14  ;;  %v347_v25 = vadd.f32 1e-12, %v331_v19 }
 0x176   : > { %v614_v28 = vpop.eup %613  ;;  %v417_v26 = vadd.f32 %v982_v50, %v394_v22  ;;  %v373_v29 = vmul.f32 %v612_v15, %v920_v36  ;;  %v348_v35 = vadd.f32 1e-12, %v332_v23  ;;  %v315_v30 = vpop.xlane.xlu1 %314 }
 0x177   : > { %v317_v31 = vpop.xlane.xlu0 %316  ;;  %v418_v32 = vadd.f32 %v982_v50, %v395_v24  ;;  %v374_v33 = vmul.f32 %v614_v28, %v926_v43  ;;  %623 = vrsqrt.f32 %v347_v25  ;;  %v333_v34 = vmul.f32 0.0078125, %v315_v30 }
 0x178   : > { %433 = vst [vmem:[%s990_s8 + $0x18] sm:$0xff] %v417_v26  ;;  %v396_v37 = vmul.f32 %v976_v42, %v373_v29  ;;  %625 = vrsqrt.f32 %v348_v35  ;;  %v334_v38 = vmul.f32 0.0078125, %v317_v31 }
 0x179   : > { %v616_v39 = vpop.eup %615  ;;  %434 = vst [vmem:[%s990_s8 + $0x20] sm:$0xff] %v418_v32  ;;  %v397_v36 = vmul.f32 %v976_v42, %v374_v33  ;;  %v349_v40 = vadd.f32 1e-12, %v333_v34 }
 0x17a   : > { %v618_v41 = vpop.eup %617  ;;  %v419_v45 = vadd.f32 %v982_v50, %v396_v37  ;;  %v375_v46 = vmul.f32 %v616_v39, %v928_v44  ;;  %v350_v43 = vadd.f32 1e-12, %v334_v38  ;;  %v319_v47 = vpop.xlane.xlu1 %318 }
 0x17b   : > { %v420_v48 = vadd.f32 %v982_v50, %v397_v36  ;;  %v376_v49 = vmul.f32 %v618_v41, %v934_v51  ;;  %627 = vrsqrt.f32 %v349_v40  ;;  %v335_v53 = vmul.f32 0.0078125, %v319_v47 }
 0x17c   : > { %435 = vst [vmem:[%s990_s8 + $0x28] sm:$0xff] %v419_v45  ;;  %v398_v54 = vmul.f32 %v976_v42, %v375_v46  ;;  %629 = vrsqrt.f32 %v350_v43 }
 0x17d   : > { %v620_v55 = vpop.eup %619  ;;  %436 = vst [vmem:[%s990_s8 + $0x30] sm:$0xff] %v420_v48  ;;  %v399_v56 = vmul.f32 %v976_v42, %v376_v49  ;;  %v351_v57 = vadd.f32 1e-12, %v335_v53 }
 0x17e   : > { %v622_v44 = vpop.eup %621  ;;  %v421_v58 = vadd.f32 %v982_v50, %v398_v54  ;;  %v377_v61 = vmul.f32 %v620_v55, %v936_v52 }
 0x17f   : > { %v422_v51 = vadd.f32 %v982_v50, %v399_v56  ;;  %v378_v20 = vmul.f32 %v622_v44, %v942_v59  ;;  %631 = vrsqrt.f32 %v351_v57 }
 0x180   : > { %437 = vst [vmem:[%s990_s8 + $0x38] sm:$0xff] %v421_v58  ;;  %v400_v62 = vmul.f32 %v976_v42, %v377_v61 }
 0x181   : > { %v624_v63 = vpop.eup %623  ;;  %438 = vst [vmem:[%s990_s8 + $0x40] sm:$0xff] %v422_v51  ;;  %v401_v0 = vmul.f32 %v976_v42, %v378_v20 }
 0x182   : > { %v626_v1 = vpop.eup %625  ;;  %v423_v2 = vadd.f32 %v982_v50, %v400_v62  ;;  %v379_v5 = vmul.f32 %v624_v63, %v945_v60 }
 0x183   : > { %v424_v52 = vadd.f32 %v982_v50, %v401_v0  ;;  %v380_v6 = vmul.f32 %v626_v1, %v952_v3 }
 0x184   : > { %439 = vst [vmem:[%s990_s8 + $0x48] sm:$0xff] %v423_v2  ;;  %v402_v59 = vmul.f32 %v976_v42, %v379_v5 }
 0x185   : > { %v628_v7 = vpop.eup %627  ;;  %440 = vst [vmem:[%s990_s8 + $0x50] sm:$0xff] %v424_v52  ;;  %v403_v8 = vmul.f32 %v976_v42, %v380_v6 }
 0x186   : > { %v630_v27 = vpop.eup %629  ;;  %v425_v9 = vadd.f32 %v982_v50, %v402_v59  ;;  %v381_v60 = vmul.f32 %v628_v7, %v955_v4 }
 0x187   : > { %v426_v10 = vadd.f32 %v982_v50, %v403_v8  ;;  %v382_v3 = vmul.f32 %v630_v27, %v962_v11 }
 0x188   : > { %441 = vst [vmem:[%s990_s8 + $0x58] sm:$0xff] %v425_v9  ;;  %v404_v21 = vmul.f32 %v976_v42, %v381_v60 }
 0x189   : > { %v632_v13 = vpop.eup %631  ;;  %442 = vst [vmem:[%s990_s8 + $0x60] sm:$0xff] %v426_v10  ;;  %v405_v16 = vmul.f32 %v976_v42, %v382_v3 }
 0x18a   : > { %v427_v17 = vadd.f32 %v982_v50, %v404_v21  ;;  %v383_v18 = vmul.f32 %v632_v13, %v965_v12 }
 0x18b   : > { %v428_v4 = vadd.f32 %v982_v50, %v405_v16 }
 0x18c   : > { %443 = vst [vmem:[%s990_s8 + $0x68] sm:$0xff] %v427_v17  ;;  %v406_v11 = vmul.f32 %v976_v42, %v383_v18 }
 0x18d   : > { %444 = vst [vmem:[%s990_s8 + $0x70] sm:$0xff] %v428_v4 }
 0x18e   : > { %v429_v12 = vadd.f32 %v982_v50, %v406_v11 }
 0x190   : > { %445 = vst [vmem:[%s990_s8 + $0x78] sm:$0xff] %v429_v12 }
 0x191   : > { %676 = shalt.err (!%p673_p2)
}
 0x192   : > { %s677_s9 = scalar_lea.hbm %s1054_s26, 2048  ;;  %s681_s23 = scalar_lea.hbm %s1105_s3, 4096 }
 0x193   : > { %p678_p4 = scmp.ne.s32.totalorder %s1054_s26, %s677_s9  ;;  %p682_p9 = scmp.lt.u32.totalorder %s1054_s26, %s1105_s3 }
 0x194   : > { %p683_p1 = scmp.lt.u32.totalorder %s681_s23, %s677_s9  ;;  %p685_p6 = scmp.lt.u32.totalorder %s677_s9, %s1054_s26 }
 0x195   : > { %p679_p5 = pnand %p678_p4, %p1112_p11 }
 0x196   : > { %p684_p3 = por %p683_p1, %p682_p9 }
 0x197   : > { %p680_p7 = pneg %p679_p5 }
 0x198   : > { %p686_p12 = por %p685_p6, %p684_p3 }
 0x19a   : > { %p687_p13 = pnand %p686_p12, %p680_p7 }
 0x19c   : > { %690 = shalt.err (!%p687_p13)
}
 0x19d   : > { %s735_s7 = smov 128   ;;  %s736_s8 = smov 8  }
 0x19e   : > { %553 = dma.vmem_to_hbm [thread:$0]  (%p1112_p11), %s1056_s19, 2048, %s1054_s26, %s447_s16, %s735_s7, %s735_s7, %s736_s8  }
 0x19f PF: > { %s475_s17 = sand.u32 1, %s717_s12   ;;  %p1113_p8 = scmp.ne.s32.totalorder %s1110_s25, 0 }
 0x1a0   : > { %p1114_p10 = scmp.ge.s32.totalorder %s729_s15, 2  ;;  %s476_s20 = scalar_lea.sflag [#allocation4], %s475_s17 }
 0x1a2   : > { %p560_p0 = pnand %p1114_p10, %p1113_p8 }
 0x1a4   : > { %712 = dma.done.wait (!%p560_p0), %s476_s20, 2048  }
 0x1a5   : > { %714 = vsyncadd (!%p560_p0), %s476_s20, 4294965248  ;;  %p16_p2 = scmp.ge.s32.totalorder %s782_s18, 4   ;;  %s1115_s12 = smov %s721_s13 }
 0x1a6   : > { %s1116_s13 = smov %s725_s14  ;;  %s1117_s14 = smov %s794_s21 }
 0x1a7   : > { %s1118_s15 = smov %s782_s18  ;;  %18 = sbr.rel (!%p16_p2) target bundleno = 5 (0x5), region = 77 }
 0x1ae   :  { %481 = vsyncpa [#allocation3], 1 }
 0x1af   :  { %483 = vsyncpa [#allocation3 + $0x1], 1 }
 0x1b0   :  { %484 = vsyncpa [#allocation4], 1 }
 0x1b1   :  { %486 = vsyncpa [#allocation4 + $0x1], 1 }

</bundles_post_ra>
